<compile_context>
chip_gen: v5e
topology: v5e:2x2
jax: 0.10.0
libtpu: 0.0.40
codegen_flags: <defaults>
</compile_context>

<pallas_src>
from functools import lru_cache

import numpy as np
import jax
import jax.numpy as jnp
from jax.experimental import pallas as pl
from jax.experimental.pallas import tpu as pltpu


@lru_cache(maxsize=None)
def _interp_matrix(in_size: int, out_size: int, mode: str) -> np.ndarray:
    """W [in_size, out_size] such that (knots @ W) == F.interpolate(
    knots[:, None, :], size=out_size, mode=mode)[:, 0, :] (PyTorch semantics,
    align_corners=False; 'nearest' is the legacy floor variant)."""
    W = np.zeros((in_size, out_size), dtype=np.float32)
    scale = in_size / out_size
    if mode == "nearest":
        for d in range(out_size):
            s = min(int(np.floor(d * scale)), in_size - 1)
            W[s, d] = 1.0
    elif mode == "linear":
        for d in range(out_size):
            src = max(scale * (d + 0.5) - 0.5, 0.0)
            x0 = min(int(np.floor(src)), in_size - 1)
            x1 = min(x0 + 1, in_size - 1)
            lam = src - x0
            W[x0, d] += 1.0 - lam
            W[x1, d] += lam
    else:
        raise NotImplementedError(f"interpolation_mode={mode!r} not supported in kernel")
    return W


def _forecast_kernel(theta_ref, w_ref, forecast_ref):
    # theta_ref: [TB, T]   w_ref: [T, F] (f32, zero rows for backcast cols)
    # forecast_ref: [TB, F]
    f = jnp.dot(theta_ref[...], w_ref[...], preferred_element_type=jnp.float32)
    forecast_ref[...] = f.astype(forecast_ref.dtype)


def _round_up(x: int, m: int) -> int:
    return ((x + m - 1) // m) * m


def identity_basis(theta: jax.Array, backcast_size: int, forecast_size: int,
                   interpolation_mode: str, batch_tile: int = 2048):
    """Pallas implementation of IdentityBasis.forward. Returns (backcast, forecast).

    Intentionally NOT wrapped in its own jax.jit so the backcast slice (and this
    pallas_call) can fuse / schedule into the surrounding model's jit.
    """
    B, T = theta.shape
    n_knots = T - backcast_size
    assert n_knots > 0, "theta must have more columns than backcast_size"

    # Backcast: a pure slice, left to XLA (fuses into the caller).
    backcast = theta[:, :backcast_size]

    # Full-row interpolation matrix: zero rows for the backcast columns, so the
    # kernel can consume contiguous theta rows with no separate knot slice.
    W_knots = _interp_matrix(n_knots, forecast_size, interpolation_mode)
    W_full = np.zeros((T, forecast_size), dtype=np.float32)
    W_full[backcast_size:, :] = W_knots
    W = jnp.asarray(W_full)  # keep f32: exact interpolation weights, f32 MXU accumulation

    itemsize = int(np.dtype(theta.dtype).itemsize)

    # --- batch tile selection ---------------------------------------------
    # * multiple of 8 (f32 sublane pack), or the full B when B is small
    # * double-buffered footprint 2*tb*(T+F)*itemsize + |W| capped ~24 MiB
    #   (fits v7x 64 MiB VMEM / the 32 MiB scoped default with headroom)
    # * at most ceil(B/2) so grid has >=2 steps -> both v7x TCs engage
    vmem_budget = 24 * 1024 * 1024
    tb_cap = max(8, ((vmem_budget - W.nbytes) // (2 * (T + forecast_size) * itemsize)) // 8 * 8)
    tb = min(int(batch_tile), int(tb_cap))
    tb = min(tb, _round_up(pl.cdiv(B, 2), 8))
    tb = _round_up(max(tb, 8), 8)
    if tb >= B:
        tb = B  # single block covering the whole (possibly non-8-aligned) batch
    grid = (pl.cdiv(B, tb),)

    vmem_limit = int(2 * tb * (T + forecast_size) * itemsize + W.nbytes) + (2 << 20)
    vmem_limit = max(vmem_limit, 4 << 20)

    cost = pl.CostEstimate(
        flops=2 * B * T * forecast_size,
        transcendentals=0,
        bytes_accessed=B * (T + forecast_size) * itemsize + W.nbytes,
    )

    forecast = pl.pallas_call(
        _forecast_kernel,
        out_shape=jax.ShapeDtypeStruct((B, forecast_size), theta.dtype),
        grid_spec=pltpu.PrefetchScalarGridSpec(
            num_scalar_prefetch=0,
            grid=grid,
            in_specs=[
                pl.BlockSpec((tb, T), lambda i: (i, 0)),                 # theta tile
                pl.BlockSpec((T, forecast_size), lambda i: (0, 0)),      # W, VMEM-resident
            ],
            out_specs=pl.BlockSpec((tb, forecast_size), lambda i: (i, 0)),
        ),
        compiler_params=pltpu.CompilerParams(
            dimension_semantics=("parallel",),   # shard batch axis across TCs on v7x
            vmem_limit_bytes=vmem_limit,
        ),
        cost_estimate=cost,
    )(theta, W)

    return backcast, forecast


def _reference(theta, backcast_size, forecast_size, mode):
    W = jnp.asarray(_interp_matrix(theta.shape[1] - backcast_size, forecast_size, mode))
    backcast = theta[:, :backcast_size]
    forecast = theta[:, backcast_size:] @ W
    return backcast, forecast


if __name__ == "__main__":
    # Module config (N-HiTS style: few knots upsampled to the forecast horizon).
    backcast_size = 32
    forecast_size = 64
    n_knots = 16
    B = 256  # with the >=2-grid-step rule this tiles as 2 x 128 rows

    key = jax.random.PRNGKey(0)
    theta = jax.random.normal(key, (B, backcast_size + n_knots), dtype=jnp.float32)

    backcast, forecast = identity_basis(theta, backcast_size, forecast_size, "linear")
    backcast = jax.block_until_ready(backcast)
    forecast = jax.block_until_ready(forecast)

    ref_b, ref_f = _reference(theta, backcast_size, forecast_size, "linear")
    np.testing.assert_allclose(np.asarray(backcast), np.asarray(ref_b), rtol=1e-6, atol=1e-6)
    np.testing.assert_allclose(np.asarray(forecast), np.asarray(ref_f), rtol=1e-5, atol=1e-5)

    # Also sanity-check nearest mode (legacy PyTorch 'nearest' semantics).
    b2, f2 = identity_basis(theta, backcast_size, forecast_size, "nearest")
    f2 = jax.block_until_ready(f2)
    _, ref_f2 = _reference(theta, backcast_size, forecast_size, "nearest")
    np.testing.assert_allclose(np.asarray(f2), np.asarray(ref_f2), rtol=1e-5, atol=1e-5)

    # Small, non-8-aligned batch still works (single full-B block).
    theta_small = jax.random.normal(jax.random.PRNGKey(0), (6, backcast_size + n_knots),
                                    dtype=jnp.float32)
    b3, f3 = identity_basis(theta_small, backcast_size, forecast_size, "linear")
    f3 = jax.block_until_ready(f3)
    _, ref_f3 = _reference(theta_small, backcast_size, forecast_size, "linear")
    np.testing.assert_allclose(np.asarray(f3), np.asarray(ref_f3), rtol=1e-5, atol=1e-5)

    print("KERNEL_OK")
</pallas_src>

<mosaic_0001>
module attributes {stable_mosaic.version = 11 : i64} {
  func.func @_forecast_kernel(%arg0: i32, %arg1: memref<128x48xf32, #tpu.memory_space<vmem>>, %arg2: memref<48x64xf32, #tpu.memory_space<vmem>>, %arg3: memref<128x64xf32, #tpu.memory_space<vmem>>) attributes {dimension_semantics = [#tpu.dimension_semantics<parallel>], iteration_bounds = array<i64: 2>, scalar_prefetch = 0 : i64, scratch_operands = 0 : i64, tpu.core_type = #tpu.core_type<tc>, window_params = [{transform_indices = @transform_0, window_bounds = array<i64: 128, 48>}, {pipeline_mode = #tpu.pipeline_mode<synchronous>, transform_indices = @transform_1, window_bounds = array<i64: 48, 64>}, {transform_indices = @transform_2, window_bounds = array<i64: 128, 64>}]} {
    %c0 = arith.constant 0 : index
    %c0_0 = arith.constant 0 : index
    %0 = vector.load %arg1[%c0, %c0_0] : memref<128x48xf32, #tpu.memory_space<vmem>>, vector<128x48xf32>
    %c0_1 = arith.constant 0 : index
    %c0_2 = arith.constant 0 : index
    %1 = vector.load %arg2[%c0_1, %c0_2] : memref<48x64xf32, #tpu.memory_space<vmem>>, vector<48x64xf32>
    %cst = arith.constant dense<0.000000e+00> : vector<128x64xf32>
    %2 = tpu.matmul %0, %1, %cst {dimension_numbers = #tpu.dot_dimension_numbers<[1], [0], [0], [1], [0, 0, 1, 1], [], []>} : vector<128x48xf32>, vector<48x64xf32>, vector<128x64xf32> -> vector<128x64xf32>
    %c0_3 = arith.constant 0 : index
    %c0_4 = arith.constant 0 : index
    %3 = vector.load %arg3[%c0_3, %c0_4] : memref<128x64xf32, #tpu.memory_space<vmem>>, vector<128x64xf32>
    tpu.vector_store %arg3[%c0_3, %c0_4], %2 {strides = array<i32>} : memref<128x64xf32, #tpu.memory_space<vmem>>, vector<128x64xf32>,
    return
  }
  func.func @transform_0(%arg0: i32) -> (i32, i32) {
    %c0_i32 = arith.constant 0 : i32
    %c0_i32_0 = arith.constant 0 : i32
    return %arg0, %c0_i32 : i32, i32
  }
  func.func @transform_1(%arg0: i32) -> (i32, i32) {
    %c0_i32 = arith.constant 0 : i32
    %c0_i32_0 = arith.constant 0 : i32
    %c0_i32_1 = arith.constant 0 : i32
    return %c0_i32, %c0_i32_0 : i32, i32
  }
  func.func @transform_2(%arg0: i32) -> (i32, i32) {
    %c0_i32 = arith.constant 0 : i32
    %c0_i32_0 = arith.constant 0 : i32
    return %arg0, %c0_i32 : i32, i32
  }
}

</mosaic_0001>

<bundles_post_ra>
// kernel: tpu_custom_call.1
= control target key start
LH: loop header
LB: loop body
LE: loop exit
PB: predicated region body
PF: predicated region fallthrough
CT: control target
= control target key end

     0   :  { %s432_s9 = smov 0   ;;  %s542_s0 = inlined_call_operand.vmem [shape: f32[256,48], index: 0, kind: input, shape index: {}]   ;;  %s543_s1 = inlined_call_operand.vmem [shape: f32[48,64], index: 1, kind: input, shape index: {}]   ;;  %s544_s2 = inlined_call_operand.vmem [shape: f32[256,64], index: 2, kind: output, shape index: {}]  }
   0x1 LB: > { %s356_s10 = sadd.s32 4294967295, %s415_s9   ;;  %p360_p0 = scmp.ge.s32.totalorder %s415_s9, 1  ;;  %s415_s9 = sphi %s432_s9, %s12_s9  }
   0x2   : > { %p113_p1 = scmp.lt.s32.totalorder %s415_s9, 3 }
   0x4   : > { %p114_p2 = pnand %p360_p0, %p113_p1 }
   0x5   : > { %s361_s15 = sshll.u32 (!%p114_p2), %s356_s10, 4 }
   0x6   : > { %117 = sbr.rel (%p114_p2) target bundleno = 181 (0xb5), region = 28  ;;  %p136_p3 = scmp.lt.s32.totalorder (!%p114_p2), %s361_s15, 31 }
   0xb   : > { %v168_v0 = vld [vmem:[%s543_s1 + $0x28] sm:$0xff]  ;;  %v167_v1 = vld [vmem:[%s543_s1 + $0x20] sm:$0xff]  ;;  %v166_v2 = vld [vmem:[%s543_s1 + $0x18] sm:$0xff]  ;;  %s546_s15 = smov (!%p136_p3, %s361_s15), 31  ;;  %vm169_vm0 = vcmask 392192   ;;  %vm283_vm1 = vcmask 523264  }
   0xc   : > { %384 = vmatpush.msra.mxu2 %v168_v0  ;;  %385 = vmatpush.msra.mxu3 %v168_v0  ;;  %v165_v3 = vld [vmem:[%s543_s1 + $0x10] sm:$0xff]  ;;  %s362_s20 = sshll.u32 %s546_s15, 3  ;;  %v164_v4 = vld [vmem:[%s543_s1 + $0x8] sm:$0xff]  ;;  %v163_v5 = vld [vmem:[%s543_s1] sm:$0xff] }
   0xd   : > { %228 = vmatpush.msra.mxu0 %v168_v0  ;;  %383 = vmatpush.msra.mxu1 %v168_v0  ;;  %s463_s25 = scalar_lea.vmem %s542_s0, %s362_s20  ;;  %s505_s30 = scalar_lea.vmem %s544_s2, %s362_s20 }
   0xe   : > { %387 = vmatpush.msra.mxu2 %v167_v1  ;;  %388 = vmatpush.msra.mxu3 %v167_v1  ;;  %v155_v6 = vld [vmem:[%s463_s25 + $0x40] sm:$0xff]  ;;  %v156_v10 = vld [vmem:[%s463_s25 + $0x48] sm:$0xff]  ;;  %v157_v14 = vld [vmem:[%s463_s25 + $0x50] sm:$0xff] }
   0xf   : > { %229 = vmatpush.msra.mxu0 %v167_v1  ;;  %386 = vmatpush.msra.mxu1 %v167_v1  ;;  %v159_v7 = vld [vmem:[%s463_s25 + $0x60] sm:$0xff]  ;;  %v160_v11 = vld [vmem:[%s463_s25 + $0x68] sm:$0xff]  ;;  %v161_v15 = vld [vmem:[%s463_s25 + $0x70] sm:$0xff] }
  0x10   : > { %390 = vmatpush.msra.mxu2 %v166_v2  ;;  %391 = vmatpush.msra.mxu3 %v166_v2  ;;  %v147_v8 = vld [vmem:[%s463_s25] sm:$0xff]  ;;  %v148_v12 = vld [vmem:[%s463_s25 + $0x8] sm:$0xff]  ;;  %v149_v16 = vld [vmem:[%s463_s25 + $0x10] sm:$0xff] }
  0x11   : > { %230 = vmatpush.msra.mxu0 %v166_v2  ;;  %389 = vmatpush.msra.mxu1 %v166_v2  ;;  %v151_v9 = vld [vmem:[%s463_s25 + $0x20] sm:$0xff]  ;;  %v152_v13 = vld [vmem:[%s463_s25 + $0x28] sm:$0xff]  ;;  %v153_v17 = vld [vmem:[%s463_s25 + $0x30] sm:$0xff] }
  0x12   : > { %393 = vmatpush.msra.mxu2 %v165_v3  ;;  %394 = vmatpush.msra.mxu3 %v165_v3  ;;  %v158_v18 = vld [vmem:[%s463_s25 + $0x58] sm:$0xff] }
  0x13   : > { %231 = vmatpush.msra.mxu0 %v165_v3  ;;  %392 = vmatpush.msra.mxu1 %v165_v3  ;;  %v162_v19 = vld [vmem:[%s463_s25 + $0x78] sm:$0xff] }
  0x14   : > { %396 = vmatpush.msra.mxu2 %v164_v4  ;;  %397 = vmatpush.msra.mxu3 %v164_v4  ;;  %v150_v20 = vld [vmem:[%s463_s25 + $0x18] sm:$0xff] }
  0x15   : > { %232 = vmatpush.msra.mxu0 %v164_v4  ;;  %395 = vmatpush.msra.mxu1 %v164_v4  ;;  %v154_v21 = vld [vmem:[%s463_s25 + $0x38] sm:$0xff] }
  0x16   : > { %399 = vmatpush.msra.mxu2 %v163_v5  ;;  %400 = vmatpush.msra.mxu3 %v163_v5 }
  0x17   : > { %373 = vmatmul.msk.f32.vlgmr.msra.gmra.mxu2 %vm169_vm0, %v155_v6  ;;  %377 = vmatmul.msk.f32.vlgmr.msra.gmra.mxu3 %vm169_vm0, %v159_v7 }
  0x18   : > { %233 = vmatpush.msra.mxu0 %v163_v5  ;;  %398 = vmatpush.msra.mxu1 %v163_v5 }
  0x19   : > { %365 = vmatmul.msk.f32.vlgmr.msra.gmra.mxu0 %vm169_vm0, %v147_v8  ;;  %369 = vmatmul.msk.f32.vlgmr.msra.gmra.mxu1 %vm169_vm0, %v151_v9 }
  0x1f   : > { %374 = vmatmul.msk.f32.gmra.mxu2 %vm169_vm0, %v156_v10  ;;  %378 = vmatmul.msk.f32.gmra.mxu3 %vm169_vm0, %v160_v11 }
  0x21   : > { %366 = vmatmul.msk.f32.gmra.mxu0 %vm169_vm0, %v148_v12  ;;  %370 = vmatmul.msk.f32.gmra.mxu1 %vm169_vm0, %v152_v13 }
  0x27   : > { %375 = vmatmul.msk.f32.gmra.mxu2 %vm169_vm0, %v157_v14  ;;  %379 = vmatmul.msk.f32.gmra.mxu3 %vm169_vm0, %v161_v15 }
  0x29   : > { %367 = vmatmul.msk.f32.gmra.mxu0 %vm169_vm0, %v149_v16  ;;  %371 = vmatmul.msk.f32.gmra.mxu1 %vm169_vm0, %v153_v17 }
  0x2f   : > { %376 = vmatmul.msk.f32.gmra.mxu2 %vm169_vm0, %v158_v18  ;;  %380 = vmatmul.msk.f32.gmra.mxu3 %vm169_vm0, %v162_v19 }
  0x31   : > { %368 = vmatmul.msk.f32.gmra.mxu0 %vm169_vm0, %v150_v20  ;;  %372 = vmatmul.msk.f32.gmra.mxu1 %vm169_vm0, %v154_v21 }
  0x96   : > { %v235_v22 = vpop.f32.mrf.mxu0  ;;  %v247_v23 = vpop.f32.mrf.mxu1 }
  0x97   : > { %284 = vst.msk [vmem:[%s505_s30] sm:$0xff] %vm283_vm1, %v235_v22 }
  0x98   : > { %288 = vst.msk [vmem:[%s505_s30 + $0x20] sm:$0xff] %vm283_vm1, %v247_v23 }
  0x9a   : > { %v259_v24 = vpop.f32.mrf.mxu2  ;;  %v271_v25 = vpop.f32.mrf.mxu3 }
  0x9b   : > { %292 = vst.msk [vmem:[%s505_s30 + $0x40] sm:$0xff] %vm283_vm1, %v259_v24 }
  0x9c   : > { %296 = vst.msk [vmem:[%s505_s30 + $0x60] sm:$0xff] %vm283_vm1, %v271_v25 }
  0x9e   : > { %v238_v26 = vpop.f32.mrf.mxu0  ;;  %v250_v27 = vpop.f32.mrf.mxu1 }
  0x9f   : > { %285 = vst.msk [vmem:[%s505_s30 + $0x8] sm:$0xff] %vm283_vm1, %v238_v26 }
  0xa0   : > { %289 = vst.msk [vmem:[%s505_s30 + $0x28] sm:$0xff] %vm283_vm1, %v250_v27 }
  0xa2   : > { %v262_v28 = vpop.f32.mrf.mxu2  ;;  %v274_v29 = vpop.f32.mrf.mxu3 }
  0xa3   : > { %293 = vst.msk [vmem:[%s505_s30 + $0x48] sm:$0xff] %vm283_vm1, %v262_v28 }
  0xa4   : > { %297 = vst.msk [vmem:[%s505_s30 + $0x68] sm:$0xff] %vm283_vm1, %v274_v29 }
  0xa6   : > { %v241_v30 = vpop.f32.mrf.mxu0  ;;  %v253_v31 = vpop.f32.mrf.mxu1 }
  0xa7   : > { %286 = vst.msk [vmem:[%s505_s30 + $0x10] sm:$0xff] %vm283_vm1, %v241_v30 }
  0xa8   : > { %290 = vst.msk [vmem:[%s505_s30 + $0x30] sm:$0xff] %vm283_vm1, %v253_v31 }
  0xaa   : > { %v265_v32 = vpop.f32.mrf.mxu2  ;;  %v277_v33 = vpop.f32.mrf.mxu3 }
  0xab   : > { %294 = vst.msk [vmem:[%s505_s30 + $0x50] sm:$0xff] %vm283_vm1, %v265_v32 }
  0xac   : > { %298 = vst.msk [vmem:[%s505_s30 + $0x70] sm:$0xff] %vm283_vm1, %v277_v33 }
  0xae   : > { %v244_v34 = vpop.f32.mrf.mxu0  ;;  %v256_v35 = vpop.f32.mrf.mxu1 }
  0xaf   : > { %287 = vst.msk [vmem:[%s505_s30 + $0x18] sm:$0xff] %vm283_vm1, %v244_v34 }
  0xb0   : > { %291 = vst.msk [vmem:[%s505_s30 + $0x38] sm:$0xff] %vm283_vm1, %v256_v35 }
  0xb2   : > { %v268_v36 = vpop.f32.mrf.mxu2  ;;  %v280_v37 = vpop.f32.mrf.mxu3 }
  0xb3   : > { %295 = vst.msk [vmem:[%s505_s30 + $0x58] sm:$0xff] %vm283_vm1, %v268_v36 }
  0xb4   : > { %299 = vst.msk [vmem:[%s505_s30 + $0x78] sm:$0xff] %vm283_vm1, %v280_v37 }
  0xb5 PF: > { %s12_s9 = sadd.s32 1, %s415_s9  }
  0xb6   : > { %p9_p4 = scmp.ge.s32.totalorder %s12_s9, 4  }
  0xb8   :  { %11 = sbr.rel (!%p9_p4) target bundleno = 1 (0x1), region = 58 }

</bundles_post_ra>
